<compile_context>
chip_gen: v5e
topology: v5e:2x2
jax: 0.10.0
libtpu: 0.0.40
codegen_flags: <defaults>
</compile_context>

<pallas_src>
import functools

import jax
import jax.numpy as jnp
from jax.experimental import pallas as pl
from jax.experimental.pallas import tpu as pltpu

EPS = 1e-5


def _round_up(n, m):
    return ((n + m - 1) // m) * m


def _pad2(a, rows, cols):
    return jnp.pad(a, ((0, rows - a.shape[0]), (0, cols - a.shape[1])))


def selectivenet_kernel(
    x_ref,        # (Bp, Dp)            bf16  flattened, zero-padded input
    wf_ref,       # (Dp, Hp)            bf16  body-block weight
    whead_ref,    # (Hp, 2*Cp + 256)    bf16  fused [wp | wa | ws1] head weight
    ws2_ref,      # (256, 128)          bf16
    ws3_ref,      # (128, 128)          bf16
    bpack_ref,    # (1, Hp + 2*Cp+256 + 3*128) f32  packed [bf|bhead|bs2|bs3|ws4-row]
    bs4_ref,      # (1,)                f32   final selector bias (SMEM scalar)
    out_ref,      # (Bp, 2*Cp + 128)    f32   lane-dense [pred | aux | sel]
    *, b_true, hp, cp,
):
    bp = x_ref.shape[0]
    head_w = 2 * cp + 256

    # Static, 128-aligned views into the packed parameter vector (zero-cost slices).
    off = 0
    bf = bpack_ref[:, off:off + hp];        off += hp
    bhead = bpack_ref[:, off:off + head_w]; off += head_w
    bs2 = bpack_ref[:, off:off + 128];      off += 128
    bs3 = bpack_ref[:, off:off + 128];      off += 128
    ws4 = bpack_ref[:, off:off + 128]       # final (128 -> 1) weight stored as a row

    # Row-validity mask so zero-padded batch rows never pollute the (training-mode,
    # full-batch) BatchNorm statistics.
    rows = jax.lax.broadcasted_iota(jnp.int32, (bp, 1), 0)
    mask = (rows < b_true).astype(jnp.float32)
    inv_b = 1.0 / float(b_true)

    def batchnorm(h):  # batch mean, biased variance, gamma=1, beta=0, eps=1e-5
        mu = jnp.sum(h * mask, axis=0, keepdims=True) * inv_b
        d = (h - mu) * mask
        var = jnp.sum(d * d, axis=0, keepdims=True) * inv_b
        return (h - mu) * jax.lax.rsqrt(var + EPS)

    # ---- body block: Flatten + Linear + ReLU (bf16 MXU operands, f32 accumulate) ----
    feat = jnp.dot(x_ref[...], wf_ref[...],
                   preferred_element_type=jnp.float32) + bf
    feat = jnp.maximum(feat, 0.0)
    feat_b = feat.astype(jnp.bfloat16)

    # ---- fused heads: predictor | aux_predictor | selector-L1 in one GEMM -----------
    head = jnp.dot(feat_b, whead_ref[...],
                   preferred_element_type=jnp.float32) + bhead
    pred = head[:, :cp]
    aux = head[:, cp:2 * cp]

    # ---- selector tail ---------------------------------------------------------------
    s = batchnorm(head[:, 2 * cp:])                         # BatchNorm1d(256)
    s = jnp.dot(s.astype(jnp.bfloat16), ws2_ref[...],
                preferred_element_type=jnp.float32) + bs2   # Linear(256 -> 128)
    s = batchnorm(s)                                        # BatchNorm1d(128, no running stats)
    s = jnp.dot(s.astype(jnp.bfloat16), ws3_ref[...],
                preferred_element_type=jnp.float32) + bs3   # Linear(128 -> 128)
    s = jnp.maximum(s, 0.0)                                 # ReLU
    s = batchnorm(s)                                        # BatchNorm1d(128)
    # Final (128 -> 1) linear as a VPU multiply + lane reduce (avoids an N=1 MXU push).
    logits = jnp.sum(s * ws4, axis=-1, keepdims=True) + bs4_ref[0]
    sel = pl.reciprocal(1.0 + jnp.exp(-logits), approx=True)  # Sigmoid (EUP path)

    # One lane-dense store instead of three narrow (masked) outputs.
    out_ref[...] = jnp.concatenate(
        [pred, aux, jnp.broadcast_to(sel, (bp, 128))], axis=1)


def selectivenet_forward(x, params):
    """x: (B, C, H, W) float32; params: dict of weights/biases (see init_params)."""
    B = x.shape[0]
    x_flat = x.reshape(B, -1).astype(jnp.float32)         # torch: x.view(x.size(0), -1)
    D = x_flat.shape[1]
    H = params["wf"].shape[1]
    C = params["wp"].shape[1]

    # Pad every kernel-visible dim to TPU-friendly sizes (sublane=8, lane=128).
    Bp = _round_up(B, 8)
    Dp = _round_up(D, 128)
    Hp = _round_up(H, 128)
    Cp = _round_up(C, 128)
    head_w = 2 * Cp + 256
    out_w = 2 * Cp + 128

    bf16 = jnp.bfloat16
    x_p = _pad2(x_flat, Bp, Dp).astype(bf16)
    wf_p = _pad2(params["wf"], Dp, Hp).astype(bf16)
    # Fused head weight: [predictor | aux_predictor | selector-L1].
    whead = jnp.concatenate(
        [_pad2(params["wp"], Hp, Cp),
         _pad2(params["wa"], Hp, Cp),
         _pad2(params["ws1"], Hp, 256)], axis=1).astype(bf16)
    ws2_p = params["ws2"].astype(bf16)                     # (256, 128)
    ws3_p = params["ws3"].astype(bf16)                     # (128, 128)
    # Single packed f32 parameter vector: [bf | bp|ba|bs1 | bs2 | bs3 | ws4-row].
    bpack = jnp.concatenate(
        [_pad2(params["bf"], 1, Hp),
         _pad2(params["bp"], 1, Cp),
         _pad2(params["ba"], 1, Cp),
         params["bs1"],
         params["bs2"],
         params["bs3"],
         params["ws4"].T], axis=1).astype(jnp.float32)     # (1, Hp + head_w + 3*128)
    bs4 = params["bs4"].reshape(1).astype(jnp.float32)     # scalar -> SMEM

    # Explicit VMEM budget sized from the actual operand footprint (plus headroom).
    operands = (x_p, wf_p, whead, ws2_p, ws3_p, bpack)
    footprint = sum(int(a.size) * a.dtype.itemsize for a in operands)
    footprint += Bp * out_w * 4
    vmem_bytes = int(min(max(4 * footprint + (2 << 20), 16 << 20), 64 << 20))

    kernel = functools.partial(selectivenet_kernel, b_true=B, hp=Hp, cp=Cp)
    vmem = pl.BlockSpec(memory_space=pltpu.MemorySpace.VMEM)
    smem = pl.BlockSpec(memory_space=pltpu.MemorySpace.SMEM)

    out = pl.pallas_call(
        kernel,
        out_shape=jax.ShapeDtypeStruct((Bp, out_w), jnp.float32),
        in_specs=[vmem, vmem, vmem, vmem, vmem, vmem, smem],
        out_specs=vmem,
        compiler_params=pltpu.CompilerParams(vmem_limit_bytes=vmem_bytes),
    )(x_p, wf_p, whead, ws2_p, ws3_p, bpack, bs4)

    prediction_out = out[:B, :C]
    selection_out = out[:B, 2 * Cp:2 * Cp + 1]
    auxiliary_out = out[:B, Cp:Cp + C]
    return prediction_out, selection_out, auxiliary_out


def init_params(key, d_in, hidden_dim, num_classes):
    """Deterministic PyTorch-style U(-1/sqrt(fan_in), 1/sqrt(fan_in)) init."""
    def linear(k, fan_in, fan_out):
        kw, kb = jax.random.split(k)
        bound = 1.0 / (fan_in ** 0.5)
        w = jax.random.uniform(kw, (fan_in, fan_out), jnp.float32, -bound, bound)
        b = jax.random.uniform(kb, (1, fan_out), jnp.float32, -bound, bound)
        return w, b

    keys = jax.random.split(key, 8)
    p = {}
    p["wf"],  p["bf"]  = linear(keys[0], d_in,       hidden_dim)   # synthetic body
    p["wp"],  p["bp"]  = linear(keys[1], hidden_dim, num_classes)  # predictor
    p["wa"],  p["ba"]  = linear(keys[2], hidden_dim, num_classes)  # aux_predictor
    p["ws1"], p["bs1"] = linear(keys[3], hidden_dim, 256)          # selector[0]
    p["ws2"], p["bs2"] = linear(keys[4], 256,        128)          # selector[2]
    p["ws3"], p["bs3"] = linear(keys[5], 128,        128)          # selector[4]
    p["ws4"], p["bs4"] = linear(keys[6], 128,        1)            # selector[7]
    return p


def reference_forward(x, params):
    """Pure-JAX reference with the same bf16 matmul operands / f32 math as the kernel."""
    B = x.shape[0]
    bf16 = jnp.bfloat16
    x_flat = x.reshape(B, -1).astype(jnp.float32)

    def bn(h):
        mu = jnp.mean(h, axis=0, keepdims=True)
        var = jnp.mean((h - mu) ** 2, axis=0, keepdims=True)
        return (h - mu) * jax.lax.rsqrt(var + EPS)

    feat = jnp.dot(x_flat.astype(bf16), params["wf"].astype(bf16),
                   preferred_element_type=jnp.float32) + params["bf"]
    feat = jnp.maximum(feat, 0.0)
    fb = feat.astype(bf16)
    pred = jnp.dot(fb, params["wp"].astype(bf16),
                   preferred_element_type=jnp.float32) + params["bp"]
    aux = jnp.dot(fb, params["wa"].astype(bf16),
                  preferred_element_type=jnp.float32) + params["ba"]
    s = jnp.dot(fb, params["ws1"].astype(bf16),
                preferred_element_type=jnp.float32) + params["bs1"]
    s = bn(s)
    s = jnp.dot(s.astype(bf16), params["ws2"].astype(bf16),
                preferred_element_type=jnp.float32) + params["bs2"]
    s = bn(s)
    s = jnp.dot(s.astype(bf16), params["ws3"].astype(bf16),
                preferred_element_type=jnp.float32) + params["bs3"]
    s = jnp.maximum(s, 0.0)
    s = bn(s)
    logits = jnp.dot(s, params["ws4"]) + params["bs4"]
    sel = jax.nn.sigmoid(logits)
    return pred, sel, aux


if __name__ == "__main__":
    # Small config: batch=4, channels=4, spatial=16x16, hidden_dim=32, classes=10.
    B, C, H, W = 4, 4, 16, 16
    HIDDEN_DIM = 32
    NUM_CLASSES = 10
    D_IN = C * H * W

    key = jax.random.PRNGKey(0)
    kx, kp = jax.random.split(key)
    x = jax.random.normal(kx, (B, C, H, W), dtype=jnp.float32)
    params = init_params(kp, D_IN, HIDDEN_DIM, NUM_CLASSES)

    pred, sel, aux = selectivenet_forward(x, params)
    jax.block_until_ready((pred, sel, aux))

    assert pred.shape == (B, NUM_CLASSES)
    assert sel.shape == (B, 1)
    assert aux.shape == (B, NUM_CLASSES)

    pred_ref, sel_ref, aux_ref = reference_forward(x, params)
    assert float(jnp.max(jnp.abs(pred - pred_ref))) < 1e-2
    assert float(jnp.max(jnp.abs(aux - aux_ref))) < 1e-2
    assert float(jnp.max(jnp.abs(sel - sel_ref))) < 5e-2

    print("KERNEL_OK")
</pallas_src>

<mosaic_0001>
module attributes {stable_mosaic.version = 11 : i64} {
  func.func @selectivenet_kernel(%arg0: memref<8x1024xbf16, #tpu.memory_space<vmem>>, %arg1: memref<1024x128xbf16, #tpu.memory_space<vmem>>, %arg2: memref<128x512xbf16, #tpu.memory_space<vmem>>, %arg3: memref<256x128xbf16, #tpu.memory_space<vmem>>, %arg4: memref<128x128xbf16, #tpu.memory_space<vmem>>, %arg5: memref<1x1024xf32, #tpu.memory_space<vmem>>, %arg6: memref<1xf32, #tpu.memory_space<smem>>, %arg7: memref<8x384xf32, #tpu.memory_space<vmem>>) attributes {dimension_semantics = [], scalar_prefetch = 0 : i64, scratch_operands = 0 : i64, tpu.core_type = #tpu.core_type<tc>} {
    %c0 = arith.constant 0 : index
    %c0_0 = arith.constant 0 : index
    %0 = vector.load %arg5[%c0, %c0_0] : memref<1x1024xf32, #tpu.memory_space<vmem>>, vector<1x128xf32>
    %c0_1 = arith.constant 0 : index
    %c128 = arith.constant 128 : index
    %1 = vector.load %arg5[%c0_1, %c128] : memref<1x1024xf32, #tpu.memory_space<vmem>>, vector<1x512xf32>
    %c0_2 = arith.constant 0 : index
    %c640 = arith.constant 640 : index
    %2 = vector.load %arg5[%c0_2, %c640] : memref<1x1024xf32, #tpu.memory_space<vmem>>, vector<1x128xf32>
    %c0_3 = arith.constant 0 : index
    %c768 = arith.constant 768 : index
    %3 = vector.load %arg5[%c0_3, %c768] : memref<1x1024xf32, #tpu.memory_space<vmem>>, vector<1x128xf32>
    %c0_4 = arith.constant 0 : index
    %c896 = arith.constant 896 : index
    %4 = vector.load %arg5[%c0_4, %c896] : memref<1x1024xf32, #tpu.memory_space<vmem>>, vector<1x128xf32>
    %5 = tpu.iota {dimensions = array<i32: 0>} : vector<8x1xi32>
    %c4_i32 = arith.constant 4 : i32
    %6 = vector.broadcast %c4_i32 : i32 to vector<8x1xi32>
    %7 = arith.cmpi slt, %5, %6 : vector<8x1xi32>
    %8 = arith.extui %7 : vector<8x1xi1> to vector<8x1xi32>
    %9 = arith.sitofp %8 : vector<8x1xi32> to vector<8x1xf32>
    %c0_5 = arith.constant 0 : index
    %c0_6 = arith.constant 0 : index
    %10 = vector.load %arg0[%c0_5, %c0_6] : memref<8x1024xbf16, #tpu.memory_space<vmem>>, vector<8x1024xbf16>
    %c0_7 = arith.constant 0 : index
    %c0_8 = arith.constant 0 : index
    %11 = vector.load %arg1[%c0_7, %c0_8] : memref<1024x128xbf16, #tpu.memory_space<vmem>>, vector<1024x128xbf16>
    %cst = arith.constant dense<0.000000e+00> : vector<8x128xf32>
    %12 = tpu.matmul %10, %11, %cst {dimension_numbers = #tpu.dot_dimension_numbers<[1], [0], [0], [1], [0, 0, 1, 1], [], []>} : vector<8x1024xbf16>, vector<1024x128xbf16>, vector<8x128xf32> -> vector<8x128xf32>
    %13 = vector.broadcast %0 : vector<1x128xf32> to vector<8x128xf32>
    %14 = arith.addf %12, %13 : vector<8x128xf32>
    %cst_9 = arith.constant 0.000000e+00 : f32
    %15 = vector.broadcast %cst_9 : f32 to vector<8x128xf32>
    %16 = arith.maximumf %14, %15 : vector<8x128xf32>
    %17 = arith.truncf %16 : vector<8x128xf32> to vector<8x128xbf16>
    %c0_10 = arith.constant 0 : index
    %c0_11 = arith.constant 0 : index
    %18 = vector.load %arg2[%c0_10, %c0_11] : memref<128x512xbf16, #tpu.memory_space<vmem>>, vector<128x512xbf16>
    %cst_12 = arith.constant dense<0.000000e+00> : vector<8x512xf32>
    %19 = tpu.matmul %17, %18, %cst_12 {dimension_numbers = #tpu.dot_dimension_numbers<[1], [0], [0], [1], [0, 0, 1, 1], [], []>} : vector<8x128xbf16>, vector<128x512xbf16>, vector<8x512xf32> -> vector<8x512xf32>
    %20 = vector.broadcast %1 : vector<1x512xf32> to vector<8x512xf32>
    %21 = arith.addf %19, %20 : vector<8x512xf32>
    %22 = vector.extract_strided_slice %21 {offsets = [0, 0], sizes = [8, 128], strides = [1, 1]} : vector<8x512xf32> to vector<8x128xf32>
    %23 = vector.extract_strided_slice %21 {offsets = [0, 128], sizes = [8, 128], strides = [1, 1]} : vector<8x512xf32> to vector<8x128xf32>
    %24 = vector.extract_strided_slice %21 {offsets = [0, 256], sizes = [8, 256], strides = [1, 1]} : vector<8x512xf32> to vector<8x256xf32>
    %25 = vector.broadcast %9 : vector<8x1xf32> to vector<8x256xf32>
    %26 = arith.mulf %24, %25 : vector<8x256xf32>
    %cst_13 = arith.constant dense<0.000000e+00> : vector<256xf32>
    %27 = vector.multi_reduction <add>, %26, %cst_13 [0] : vector<8x256xf32> to vector<256xf32>
    %28 = vector.shape_cast %27 : vector<256xf32> to vector<1x256xf32>
    %cst_14 = arith.constant 2.500000e-01 : f32
    %29 = vector.broadcast %cst_14 : f32 to vector<1x256xf32>
    %30 = arith.mulf %28, %29 : vector<1x256xf32>
    %31 = vector.broadcast %30 : vector<1x256xf32> to vector<8x256xf32>
    %32 = arith.subf %24, %31 : vector<8x256xf32>
    %33 = vector.broadcast %9 : vector<8x1xf32> to vector<8x256xf32>
    %34 = arith.mulf %32, %33 : vector<8x256xf32>
    %35 = arith.mulf %34, %34 : vector<8x256xf32>
    %cst_15 = arith.constant dense<0.000000e+00> : vector<256xf32>
    %36 = vector.multi_reduction <add>, %35, %cst_15 [0] : vector<8x256xf32> to vector<256xf32>
    %37 = vector.shape_cast %36 : vector<256xf32> to vector<1x256xf32>
    %cst_16 = arith.constant 2.500000e-01 : f32
    %38 = vector.broadcast %cst_16 : f32 to vector<1x256xf32>
    %39 = arith.mulf %37, %38 : vector<1x256xf32>
    %40 = vector.broadcast %30 : vector<1x256xf32> to vector<8x256xf32>
    %41 = arith.subf %24, %40 : vector<8x256xf32>
    %cst_17 = arith.constant 9.99999974E-6 : f32
    %42 = vector.broadcast %cst_17 : f32 to vector<1x256xf32>
    %43 = arith.addf %39, %42 : vector<1x256xf32>
    %44 = math.rsqrt %43 : vector<1x256xf32>
    %45 = vector.broadcast %44 : vector<1x256xf32> to vector<8x256xf32>
    %46 = arith.mulf %41, %45 : vector<8x256xf32>
    %47 = arith.truncf %46 : vector<8x256xf32> to vector<8x256xbf16>
    %c0_18 = arith.constant 0 : index
    %c0_19 = arith.constant 0 : index
    %48 = vector.load %arg3[%c0_18, %c0_19] : memref<256x128xbf16, #tpu.memory_space<vmem>>, vector<256x128xbf16>
    %cst_20 = arith.constant dense<0.000000e+00> : vector<8x128xf32>
    %49 = tpu.matmul %47, %48, %cst_20 {dimension_numbers = #tpu.dot_dimension_numbers<[1], [0], [0], [1], [0, 0, 1, 1], [], []>} : vector<8x256xbf16>, vector<256x128xbf16>, vector<8x128xf32> -> vector<8x128xf32>
    %50 = vector.broadcast %2 : vector<1x128xf32> to vector<8x128xf32>
    %51 = arith.addf %49, %50 : vector<8x128xf32>
    %52 = vector.broadcast %9 : vector<8x1xf32> to vector<8x128xf32>
    %53 = arith.mulf %51, %52 : vector<8x128xf32>
    %cst_21 = arith.constant dense<0.000000e+00> : vector<128xf32>
    %54 = vector.multi_reduction <add>, %53, %cst_21 [0] : vector<8x128xf32> to vector<128xf32>
    %55 = vector.shape_cast %54 : vector<128xf32> to vector<1x128xf32>
    %cst_22 = arith.constant 2.500000e-01 : f32
    %56 = vector.broadcast %cst_22 : f32 to vector<1x128xf32>
    %57 = arith.mulf %55, %56 : vector<1x128xf32>
    %58 = vector.broadcast %57 : vector<1x128xf32> to vector<8x128xf32>
    %59 = arith.subf %51, %58 : vector<8x128xf32>
    %60 = vector.broadcast %9 : vector<8x1xf32> to vector<8x128xf32>
    %61 = arith.mulf %59, %60 : vector<8x128xf32>
    %62 = arith.mulf %61, %61 : vector<8x128xf32>
    %cst_23 = arith.constant dense<0.000000e+00> : vector<128xf32>
    %63 = vector.multi_reduction <add>, %62, %cst_23 [0] : vector<8x128xf32> to vector<128xf32>
    %64 = vector.shape_cast %63 : vector<128xf32> to vector<1x128xf32>
    %cst_24 = arith.constant 2.500000e-01 : f32
    %65 = vector.broadcast %cst_24 : f32 to vector<1x128xf32>
    %66 = arith.mulf %64, %65 : vector<1x128xf32>
    %67 = vector.broadcast %57 : vector<1x128xf32> to vector<8x128xf32>
    %68 = arith.subf %51, %67 : vector<8x128xf32>
    %cst_25 = arith.constant 9.99999974E-6 : f32
    %69 = vector.broadcast %cst_25 : f32 to vector<1x128xf32>
    %70 = arith.addf %66, %69 : vector<1x128xf32>
    %71 = math.rsqrt %70 : vector<1x128xf32>
    %72 = vector.broadcast %71 : vector<1x128xf32> to vector<8x128xf32>
    %73 = arith.mulf %68, %72 : vector<8x128xf32>
    %74 = arith.truncf %73 : vector<8x128xf32> to vector<8x128xbf16>
    %c0_26 = arith.constant 0 : index
    %c0_27 = arith.constant 0 : index
    %75 = vector.load %arg4[%c0_26, %c0_27] : memref<128x128xbf16, #tpu.memory_space<vmem>>, vector<128x128xbf16>
    %cst_28 = arith.constant dense<0.000000e+00> : vector<8x128xf32>
    %76 = tpu.matmul %74, %75, %cst_28 {dimension_numbers = #tpu.dot_dimension_numbers<[1], [0], [0], [1], [0, 0, 1, 1], [], []>} : vector<8x128xbf16>, vector<128x128xbf16>, vector<8x128xf32> -> vector<8x128xf32>
    %77 = vector.broadcast %3 : vector<1x128xf32> to vector<8x128xf32>
    %78 = arith.addf %76, %77 : vector<8x128xf32>
    %cst_29 = arith.constant 0.000000e+00 : f32
    %79 = vector.broadcast %cst_29 : f32 to vector<8x128xf32>
    %80 = arith.maximumf %78, %79 : vector<8x128xf32>
    %81 = vector.broadcast %9 : vector<8x1xf32> to vector<8x128xf32>
    %82 = arith.mulf %80, %81 : vector<8x128xf32>
    %cst_30 = arith.constant dense<0.000000e+00> : vector<128xf32>
    %83 = vector.multi_reduction <add>, %82, %cst_30 [0] : vector<8x128xf32> to vector<128xf32>
    %84 = vector.shape_cast %83 : vector<128xf32> to vector<1x128xf32>
    %cst_31 = arith.constant 2.500000e-01 : f32
    %85 = vector.broadcast %cst_31 : f32 to vector<1x128xf32>
    %86 = arith.mulf %84, %85 : vector<1x128xf32>
    %87 = vector.broadcast %86 : vector<1x128xf32> to vector<8x128xf32>
    %88 = arith.subf %80, %87 : vector<8x128xf32>
    %89 = vector.broadcast %9 : vector<8x1xf32> to vector<8x128xf32>
    %90 = arith.mulf %88, %89 : vector<8x128xf32>
    %91 = arith.mulf %90, %90 : vector<8x128xf32>
    %cst_32 = arith.constant dense<0.000000e+00> : vector<128xf32>
    %92 = vector.multi_reduction <add>, %91, %cst_32 [0] : vector<8x128xf32> to vector<128xf32>
    %93 = vector.shape_cast %92 : vector<128xf32> to vector<1x128xf32>
    %cst_33 = arith.constant 2.500000e-01 : f32
    %94 = vector.broadcast %cst_33 : f32 to vector<1x128xf32>
    %95 = arith.mulf %93, %94 : vector<1x128xf32>
    %96 = vector.broadcast %86 : vector<1x128xf32> to vector<8x128xf32>
    %97 = arith.subf %80, %96 : vector<8x128xf32>
    %cst_34 = arith.constant 9.99999974E-6 : f32
    %98 = vector.broadcast %cst_34 : f32 to vector<1x128xf32>
    %99 = arith.addf %95, %98 : vector<1x128xf32>
    %100 = math.rsqrt %99 : vector<1x128xf32>
    %101 = vector.broadcast %100 : vector<1x128xf32> to vector<8x128xf32>
    %102 = arith.mulf %97, %101 : vector<8x128xf32>
    %103 = vector.broadcast %4 : vector<1x128xf32> to vector<8x128xf32>
    %104 = arith.mulf %102, %103 : vector<8x128xf32>
    %cst_35 = arith.constant dense<0.000000e+00> : vector<8xf32>
    %105 = vector.multi_reduction <add>, %104, %cst_35 [1] : vector<8x128xf32> to vector<8xf32>
    %106 = vector.shape_cast %105 : vector<8xf32> to vector<8x1xf32>
    %c0_36 = arith.constant 0 : index
    %107 = memref.load %arg6[%c0_36] : memref<1xf32, #tpu.memory_space<smem>>
    %108 = vector.broadcast %107 : f32 to vector<8x1xf32>
    %109 = arith.addf %106, %108 : vector<8x1xf32>
    %cst_37 = arith.constant 0.000000e+00 : f32
    %110 = vector.broadcast %cst_37 : f32 to vector<8x1xf32>
    %111 = arith.subf %110, %109 : vector<8x1xf32>
    %112 = math.exp %111 : vector<8x1xf32>
    %cst_38 = arith.constant 1.000000e+00 : f32
    %113 = vector.broadcast %cst_38 : f32 to vector<8x1xf32>
    %114 = arith.addf %113, %112 : vector<8x1xf32>
    %115 = tpu.reciprocal %114 {approx = true} : vector<8x1xf32> -> vector<8x1xf32>
    %116 = vector.shape_cast %115 : vector<8x1xf32> to vector<8x1xf32>
    %117 = vector.broadcast %116 : vector<8x1xf32> to vector<8x128xf32>
    %118 = tpu.concatenate %22, %23, %117 in 1 : vector<8x128xf32>, vector<8x128xf32>, vector<8x128xf32> -> vector<8x384xf32>
    %c0_39 = arith.constant 0 : index
    %c0_40 = arith.constant 0 : index
    %119 = vector.load %arg7[%c0_39, %c0_40] : memref<8x384xf32, #tpu.memory_space<vmem>>, vector<8x384xf32>
    tpu.vector_store %arg7[%c0_39, %c0_40], %118 {strides = array<i32>} : memref<8x384xf32, #tpu.memory_space<vmem>>, vector<8x384xf32>,
    return
  }
}

</mosaic_0001>

<bundles_post_ra>
// kernel: tpu_custom_call.1
= control target key start
LH: loop header
LB: loop body
LE: loop exit
PB: predicated region body
PF: predicated region fallthrough
CT: control target
= control target key end

     0   :  { %13 = vsyncpa [#allocation4], 0  ;;  %s2334_s0 = inlined_call_operand.hbm [shape: bf16[8,1024], index: 0, kind: input, shape index: {}]   ;;  %s2335_s1 = inlined_call_operand.hbm [shape: bf16[1024,128], index: 1, kind: input, shape index: {}]   ;;  %s2336_s2 = inlined_call_operand.hbm [shape: bf16[128,512], index: 2, kind: input, shape index: {}]   ;;  %s2337_s3 = inlined_call_operand.hbm [shape: bf16[256,128], index: 3, kind: input, shape index: {}]   ;;  %s2338_s4 = inlined_call_operand.hbm [shape: bf16[128,128], index: 4, kind: input, shape index: {}]   ;;  %s2339_s5 = inlined_call_operand.hbm [shape: f32[1,1024], index: 5, kind: input, shape index: {}]   ;;  %s2340_s6 = inlined_call_operand.<no memory space> [shape: f32[1], index: 6, kind: input, shape index: {}]   ;;  %s2341_s7 = inlined_call_operand.hbm [shape: f32[8,384], index: 7, kind: output, shape index: {}]  }
   0x1   :  { %14 = vsyncpa [#allocation7], 0 }
   0x2   :  { %15 = vsyncpa [#allocation10], 0 }
   0x3   :  { %16 = vsyncpa [#allocation13], 0  ;;  %s33_s26 = sshll.u32 %s2335_s1, 4  ;;  %s34_s26 = int_to_ptr.hbm [resolvable:$true] %s33_s26 }
   0x4   :  { %17 = vsyncpa [#allocation5], 0  ;;  %s2239_s27 = smov [#allocation6]   ;;  %s59_s8 = sshll.u32 %s2337_s3, 4  ;;  %s60_s8 = int_to_ptr.hbm [resolvable:$true] %s59_s8 }
   0x5   :  { %s35_s28 = sshll.u32 %s2239_s27, 4  ;;  %s2240_s9 = smov 64   ;;  %s36_s28 = int_to_ptr.vmem [resolvable:$true] %s35_s28 }
   0x6   :  { %s2241_s10 = smov 4   ;;  %s2242_s11 = smov [#allocation9]  }
   0x7   :  { %41 = dma.hbm_to_vmem [thread:$0]  %s34_s26, 8192, %s36_s28, [#allocation7], %s2240_s9, %s2240_s9, %s2241_s10  }
   0x8   :  { %s61_s12 = sshll.u32 %s2242_s11, 4  ;;  %s23_s14 = sshll.u32 %s2334_s0, 4  ;;  %s62_s12 = int_to_ptr.vmem [resolvable:$true] %s61_s12  ;;  %s24_s14 = int_to_ptr.hbm [resolvable:$true] %s23_s14 }
   0x9   :  { %67 = dma.hbm_to_vmem [thread:$0]  %s60_s8, 2048, %s62_s12, [#allocation10], %s2240_s9, %s2240_s9, %s2241_s10  }
   0xa   :  { %s46_s16 = sshll.u32 %s2336_s2, 4  ;;  %s2243_s17 = smov [#allocation3]   ;;  %s47_s16 = int_to_ptr.hbm [resolvable:$true] %s46_s16 }
   0xb   :  { %s25_s18 = sshll.u32 %s2243_s17, 4  ;;  %s2244_s19 = smov [#allocation8]   ;;  %s26_s18 = int_to_ptr.vmem [resolvable:$true] %s25_s18 }
   0xc   :  { %28 = dma.hbm_to_vmem [thread:$0]  %s24_s14, 512, %s26_s18, [#allocation4]  }
   0xd   :  { %s48_s20 = sshll.u32 %s2244_s19, 4  ;;  %s2245_s21 = smov 256   ;;  %s49_s20 = int_to_ptr.vmem [resolvable:$true] %s48_s20 }
   0xe   :  { %s2246_s0 = smov 16   ;;  %s72_s24 = sshll.u32 %s2338_s4, 4  ;;  %s73_s24 = int_to_ptr.hbm [resolvable:$true] %s72_s24 }
   0xf   :  { %54 = dma.hbm_to_vmem [thread:$0]  %s47_s16, 4096, %s49_s20, [#allocation7], %s2245_s21, %s2245_s21, %s2246_s0  }
  0x10   :  { %s2247_s25 = smov [#allocation11]   ;;  %s86_s28 = sshll.u32 %s2339_s5, 4  ;;  %s87_s28 = int_to_ptr.hbm [resolvable:$true] %s86_s28 }
  0x11   :  { %s74_s26 = sshll.u32 %s2247_s25, 4  ;;  %s2248_s29 = smov [#allocation12]   ;;  %s75_s26 = int_to_ptr.vmem [resolvable:$true] %s74_s26 }
  0x12   :  { %80 = dma.hbm_to_vmem [thread:$0]  %s73_s24, 1024, %s75_s26, [#allocation10], %s2240_s9, %s2240_s9, %s2241_s10  }
  0x13   :  { %s88_s30 = sshll.u32 %s2248_s29, 4  ;;  %s89_s30 = int_to_ptr.vmem [resolvable:$true] %s88_s30 }
  0x14   :  { %91 = dma.hbm_to_vmem [thread:$0]  %s87_s28, 128, %s89_s30, [#allocation13]  }
  0x15   :  { %2229 = dma.done.wait [#allocation4], 512  }
  0x16   :  { %2230 = vsyncadd [#allocation4], 4294966784 }
  0x17   :  { %2231 = dma.done.wait [#allocation7], 12288  }
  0x18   :  { %2232 = vsyncadd [#allocation7], 4294955008 }
  0x19   :  { %2233 = dma.done.wait [#allocation10], 3072  }
  0x1a   :  { %2234 = vsyncadd [#allocation10], 4294964224 }
  0x1b   :  { %2235 = dma.done.wait [#allocation13], 128  }
  0x1c   :  { %2236 = vsyncadd [#allocation13], 4294967168  ;;  %v1920_v0 = vld [vmem:[#allocation6 + $0x38] sm:$0xff]  ;;  %v1919_v4 = vld [vmem:[#allocation6 + $0x30] sm:$0xff]  ;;  %s2250_s8 = smov [#allocation14]   ;;  %s1419_s12 = sshll.u32 %s2341_s7, 4  ;;  %s1420_s12 = int_to_ptr.hbm [resolvable:$true] %s1419_s12 }
  0x1d   :  { %v1928_v1 = vld [vmem:[#allocation6 + $0x78] sm:$0xff]  ;;  %675 = vmatpush.bf16.msra.mxu0 %v1920_v0  ;;  %v1927_v5 = vld [vmem:[#allocation6 + $0x70] sm:$0xff]  ;;  %v1918_v8 = vld [vmem:[#allocation6 + $0x28] sm:$0xff]  ;;  %s1417_s9 = sshll.u32 %s2250_s8, 4  ;;  %s1418_s9 = int_to_ptr.vmem [resolvable:$true] %s1417_s9 }
  0x1e   :  { %v1936_v2 = vld [vmem:[#allocation6 + $0xb8] sm:$0xff]  ;;  %688 = vmatpush.bf16.msra.mxu1 %v1928_v1  ;;  %v1935_v6 = vld [vmem:[#allocation6 + $0xb0] sm:$0xff]  ;;  %v1926_v9 = vld [vmem:[#allocation6 + $0x68] sm:$0xff] }
  0x1f   :  { %v1944_v3 = vld [vmem:[#allocation6 + $0xf8] sm:$0xff]  ;;  %701 = vmatpush.bf16.msra.mxu2 %v1936_v2  ;;  %v1943_v7 = vld [vmem:[#allocation6 + $0xf0] sm:$0xff]  ;;  %v1934_v10 = vld [vmem:[#allocation6 + $0xa8] sm:$0xff] }
  0x20   :  { %714 = vmatpush.bf16.msra.mxu3 %v1944_v3  ;;  %v1942_v11 = vld [vmem:[#allocation6 + $0xe8] sm:$0xff]  ;;  %v1917_v12 = vld [vmem:[#allocation6 + $0x20] sm:$0xff]  ;;  %v1916_v16 = vld [vmem:[#allocation6 + $0x18] sm:$0xff] }
  0x21   :  { %676 = vmatpush.bf16.msra.mxu0 %v1919_v4  ;;  %v1925_v13 = vld [vmem:[#allocation6 + $0x60] sm:$0xff]  ;;  %v1924_v17 = vld [vmem:[#allocation6 + $0x58] sm:$0xff]  ;;  %v1915_v20 = vld [vmem:[#allocation6 + $0x10] sm:$0xff] }
  0x22   :  { %689 = vmatpush.bf16.msra.mxu1 %v1927_v5  ;;  %v1933_v14 = vld [vmem:[#allocation6 + $0xa0] sm:$0xff]  ;;  %v1932_v18 = vld [vmem:[#allocation6 + $0x98] sm:$0xff]  ;;  %v1923_v21 = vld [vmem:[#allocation6 + $0x50] sm:$0xff] }
  0x23   :  { %702 = vmatpush.bf16.msra.mxu2 %v1935_v6  ;;  %v1941_v15 = vld [vmem:[#allocation6 + $0xe0] sm:$0xff]  ;;  %v1940_v19 = vld [vmem:[#allocation6 + $0xd8] sm:$0xff]  ;;  %v1931_v22 = vld [vmem:[#allocation6 + $0x90] sm:$0xff] }
  0x24   :  { %715 = vmatpush.bf16.msra.mxu3 %v1943_v7  ;;  %v1939_v23 = vld [vmem:[#allocation6 + $0xd0] sm:$0xff]  ;;  %v1914_v24 = vld [vmem:[#allocation6 + $0x8] sm:$0xff]  ;;  %v128_v29 = vld [vmem:[#allocation3] sm:$0xff] }
  0x25   :  { %677 = vmatpush.bf16.msra.mxu0 %v1918_v8  ;;  %v1922_v25 = vld [vmem:[#allocation6 + $0x48] sm:$0xff]  ;;  %v1913_v30 = vld [vmem:[#allocation6] sm:$0xff]  ;;  %v267_v33 = vunpack.c.l.b16 %v128_v29  ;;  %v268_v37 = vunpack.c.h.b16 %v128_v29  ;;  %v1952_v38 = vld [vmem:[#allocation6 + $0x138] sm:$0xff] }
  0x26   :  { %690 = vmatpush.bf16.msra.mxu1 %v1926_v9  ;;  %v1930_v26 = vld [vmem:[#allocation6 + $0x88] sm:$0xff]  ;;  %v1921_v31 = vld [vmem:[#allocation6 + $0x40] sm:$0xff]  ;;  %v1960_v39 = vld [vmem:[#allocation6 + $0x178] sm:$0xff] }
  0x27   :  { %703 = vmatpush.bf16.msra.mxu2 %v1934_v10  ;;  %v1938_v27 = vld [vmem:[#allocation6 + $0xc8] sm:$0xff]  ;;  %v1929_v34 = vld [vmem:[#allocation6 + $0x80] sm:$0xff]  ;;  %v1968_v40 = vld [vmem:[#allocation6 + $0x1b8] sm:$0xff]  ;;  %v275_v43 = vpack.c.b16 %v267_v33, %v267_v33  ;;  %v276_v45 = vpack.c.b16 %v268_v37, %v268_v37 }
  0x28   :  { %716 = vmatpush.bf16.msra.mxu3 %v1942_v11  ;;  %v129_v28 = vld [vmem:[#allocation3 + $0x8] sm:$0xff]  ;;  %v1937_v35 = vld [vmem:[#allocation6 + $0xc0] sm:$0xff]  ;;  %v1976_v41 = vld [vmem:[#allocation6 + $0x1f8] sm:$0xff] }
  0x29   :  { %678 = vmatpush.bf16.msra.mxu0 %v1917_v12  ;;  %v269_v32 = vunpack.c.l.b16 %v129_v28  ;;  %v270_v36 = vunpack.c.h.b16 %v129_v28  ;;  %v1951_v46 = vld [vmem:[#allocation6 + $0x130] sm:$0xff]  ;;  %v1950_v50 = vld [vmem:[#allocation6 + $0x128] sm:$0xff]  ;;  %v1949_v54 = vld [vmem:[#allocation6 + $0x120] sm:$0xff] }
  0x2a   :  { %691 = vmatpush.bf16.msra.mxu1 %v1925_v13  ;;  %v1959_v47 = vld [vmem:[#allocation6 + $0x170] sm:$0xff]  ;;  %v1958_v51 = vld [vmem:[#allocation6 + $0x168] sm:$0xff]  ;;  %v1957_v55 = vld [vmem:[#allocation6 + $0x160] sm:$0xff] }
  0x2b   :  { %704 = vmatpush.bf16.msra.mxu2 %v1933_v14  ;;  %v277_v42 = vpack.c.b16 %v269_v32, %v269_v32  ;;  %v278_v44 = vpack.c.b16 %v270_v36, %v270_v36  ;;  %v1967_v48 = vld [vmem:[#allocation6 + $0x1b0] sm:$0xff]  ;;  %v1966_v52 = vld [vmem:[#allocation6 + $0x1a8] sm:$0xff]  ;;  %v1965_v56 = vld [vmem:[#allocation6 + $0x1a0] sm:$0xff] }
  0x2c   :  { %717 = vmatpush.bf16.msra.mxu3 %v1941_v15  ;;  %v1975_v49 = vld [vmem:[#allocation6 + $0x1f0] sm:$0xff]  ;;  %v1974_v53 = vld [vmem:[#allocation6 + $0x1e8] sm:$0xff]  ;;  %v1973_v57 = vld [vmem:[#allocation6 + $0x1e0] sm:$0xff] }
  0x2d   :  { %679 = vmatpush.bf16.msra.mxu0 %v1916_v16  ;;  %v1948_v58 = vld [vmem:[#allocation6 + $0x118] sm:$0xff]  ;;  %v1947_v62 = vld [vmem:[#allocation6 + $0x110] sm:$0xff]  ;;  %v1946_v2 = vld [vmem:[#allocation6 + $0x108] sm:$0xff] }
  0x2e   :  { %692 = vmatpush.bf16.msra.mxu1 %v1924_v17  ;;  %v1956_v59 = vld [vmem:[#allocation6 + $0x158] sm:$0xff]  ;;  %v1955_v63 = vld [vmem:[#allocation6 + $0x150] sm:$0xff]  ;;  %v1954_v3 = vld [vmem:[#allocation6 + $0x148] sm:$0xff] }
  0x2f   :  { %705 = vmatpush.bf16.msra.mxu2 %v1932_v18  ;;  %v1964_v60 = vld [vmem:[#allocation6 + $0x198] sm:$0xff]  ;;  %v1963_v0 = vld [vmem:[#allocation6 + $0x190] sm:$0xff]  ;;  %v1962_v5 = vld [vmem:[#allocation6 + $0x188] sm:$0xff] }
  0x30   :  { %718 = vmatpush.bf16.msra.mxu3 %v1940_v19  ;;  %v1972_v61 = vld [vmem:[#allocation6 + $0x1d8] sm:$0xff]  ;;  %v1971_v1 = vld [vmem:[#allocation6 + $0x1d0] sm:$0xff]  ;;  %v1970_v6 = vld [vmem:[#allocation6 + $0x1c8] sm:$0xff] }
  0x31   :  { %680 = vmatpush.bf16.msra.mxu0 %v1915_v20  ;;  %v130_v4 = vld [vmem:[#allocation3 + $0x10] sm:$0xff]  ;;  %v131_v7 = vld [vmem:[#allocation3 + $0x18] sm:$0xff]  ;;  %v1945_v10 = vld [vmem:[#allocation6 + $0x100] sm:$0xff] }
  0x32   :  { %693 = vmatpush.bf16.msra.mxu1 %v1923_v21  ;;  %v271_v8 = vunpack.c.l.b16 %v130_v4  ;;  %v272_v9 = vunpack.c.h.b16 %v130_v4  ;;  %v1953_v11 = vld [vmem:[#allocation6 + $0x140] sm:$0xff]  ;;  %v273_v12 = vunpack.c.l.b16 %v131_v7  ;;  %v274_v13 = vunpack.c.h.b16 %v131_v7  ;;  %v2007_v21 = vld [vmem:[#allocation8 + $0xec] sm:$0xf0]  ;;  %v2006_v29 = vld [vmem:[#allocation8 + $0xec] sm:$0xf] }
  0x33   :  { %706 = vmatpush.bf16.msra.mxu2 %v1931_v22  ;;  %v1961_v14 = vld [vmem:[#allocation6 + $0x180] sm:$0xff]  ;;  %v2003_v33 = vld [vmem:[#allocation8 + $0xcc] sm:$0xf0] }
  0x34   :  { %719 = vmatpush.bf16.msra.mxu3 %v1939_v23  ;;  %v1969_v15 = vld [vmem:[#allocation6 + $0x1c0] sm:$0xff]  ;;  %v279_v16 = vpack.c.b16 %v271_v8, %v271_v8  ;;  %v280_v17 = vpack.c.b16 %v272_v9, %v272_v9  ;;  %v281_v18 = vpack.c.b16 %v273_v12, %v273_v12  ;;  %v282_v19 = vpack.c.b16 %v274_v13, %v274_v13  ;;  %v1741_v8 = vld [vmem:[#allocation8 + $0x70] sm:$0xf0]  ;;  %v1747_v9 = vld [vmem:[#allocation8 + $0x68] sm:$0xf] }
  0x35   :  { %681 = vmatpush.bf16.msra.mxu0 %v1914_v24  ;;  %v1803_v20 = vld [vmem:[#allocation8 + $0xe0] sm:$0xf]  ;;  %v2005_v22 = vld [vmem:[#allocation8 + $0xe4] sm:$0xf]  ;;  %v1805_v24 = vld [vmem:[#allocation8 + $0xf0] sm:$0xf0] }
  0x36   :  { %694 = vmatpush.bf16.msra.mxu1 %v1922_v25  ;;  %v1804_v23 = vor.u32 %v2007_v21, %v1803_v20  ;;  %v1811_v25 = vld [vmem:[#allocation8 + $0xe8] sm:$0xf]  ;;  %v1739_v4 = vld [vmem:[#allocation8 + $0x60] sm:$0xf]  ;;  %v1990_v13 = vld [vmem:[#allocation8 + $0x6c] sm:$0xf] }
  0x37   :  { %707 = vmatpush.bf16.msra.mxu2 %v1930_v26  ;;  %v2008_v26 = vld [vmem:[#allocation8 + $0xf4] sm:$0xf0]  ;;  %v1725_v21 = vld [vmem:[#allocation8 + $0x50] sm:$0xf0] }
  0x38   :  { %720 = vmatpush.bf16.msra.mxu3 %v1938_v27  ;;  %v1808_v27 = vor.u32 %v2005_v22, %v1805_v24  ;;  %v1812_v28 = vor.u32 %v2008_v26, %v1811_v25  ;;  %v1731_v22 = vld [vmem:[#allocation8 + $0x48] sm:$0xf] }
  0x39   :  { %682 = vmatpush.bf16.msra.mxu0 %v1913_v30  ;;  %v1813_v30 = vld [vmem:[#allocation8 + $0xf8] sm:$0xf0] }
  0x3a   :  { %695 = vmatpush.bf16.msra.mxu1 %v1921_v31  ;;  %v1787_v31 = vld [vmem:[#allocation8 + $0xc0] sm:$0xf]  ;;  %v1816_v32 = vor.u32 %v2006_v29, %v1813_v30 }
  0x3b   :  { %708 = vmatpush.bf16.msra.mxu2 %v1929_v34  ;;  %v2001_v34 = vld [vmem:[#allocation8 + $0xc4] sm:$0xf]  ;;  %v1788_v36 = vor.u32 %v2003_v33, %v1787_v31  ;;  %v1707_v30 = vld [vmem:[#allocation8 + $0x20] sm:$0xf]  ;;  %v1983_v31 = vld [vmem:[#allocation8 + $0x2c] sm:$0xf0] }
  0x3c   :  { %721 = vmatpush.bf16.msra.mxu3 %v1937_v35  ;;  %683 = vmatmul.bf16.vlgmr.msra.gmra.mxu0 %v275_v43  ;;  %v1789_v35 = vld [vmem:[#allocation8 + $0xd0] sm:$0xf0]  ;;  %v1708_v33 = vor.u32 %v1983_v31, %v1707_v30 }
  0x3d   :  { %727 = vmatpush.bf16.msrb.mxu0 %v1952_v38  ;;  %696 = vmatmul.bf16.vlgmr.msra.gmra.mxu1 %v276_v45  ;;  %v1792_v37 = vor.u32 %v2001_v34, %v1789_v35  ;;  %v1795_v38 = vld [vmem:[#allocation8 + $0xc8] sm:$0xf]  ;;  %v1999_v45 = vld [vmem:[#allocation8 + $0xac] sm:$0xf0]  ;;  %v1709_v34 = vld [vmem:[#allocation8 + $0x30] sm:$0xf0] }
  0x3e   :  { %740 = vmatpush.bf16.msrb.mxu1 %v1960_v39  ;;  %709 = vmatmul.bf16.vlgmr.msra.gmra.mxu2 %v277_v42  ;;  %v2004_v39 = vld [vmem:[#allocation8 + $0xd4] sm:$0xf0]  ;;  %v1797_v42 = vld [vmem:[#allocation8 + $0xd8] sm:$0xf0]  ;;  %v1715_v35 = vld [vmem:[#allocation8 + $0x28] sm:$0xf] }
  0x3f   :  { %753 = vmatpush.bf16.msrb.mxu2 %v1968_v40  ;;  %722 = vmatmul.bf16.vlgmr.msra.gmra.mxu3 %v278_v44  ;;  %v2002_v40 = vld [vmem:[#allocation8 + $0xcc] sm:$0xf]  ;;  %v1771_v44 = vld [vmem:[#allocation8 + $0xa0] sm:$0xf] }
  0x40   :  { %766 = vmatpush.bf16.msrb.mxu3 %v1976_v41  ;;  %v1796_v41 = vor.u32 %v2004_v39, %v1795_v38  ;;  %v1800_v43 = vor.u32 %v2002_v40, %v1797_v42  ;;  %v1982_v39 = vld [vmem:[#allocation8 + $0x2c] sm:$0xf]  ;;  %v1717_v40 = vld [vmem:[#allocation8 + $0x38] sm:$0xf0] }
  0x41   :  { %728 = vmatpush.bf16.msrb.mxu0 %v1951_v46  ;;  %v1997_v46 = vld [vmem:[#allocation8 + $0xa4] sm:$0xf]  ;;  %v1720_v42 = vor.u32 %v1982_v39, %v1717_v40  ;;  %v2023_v39 = vld [vmem:[#allocation9 + $0x70] sm:$0xff] }
  0x42   :  { %741 = vmatpush.bf16.msrb.mxu1 %v1959_v47  ;;  %v1772_v47 = vor.u32 %v1999_v45, %v1771_v44  ;;  %v1691_v44 = vld [vmem:[#allocation8] sm:$0xf]  ;;  %v1979_v45 = vld [vmem:[#allocation8 + $0xc] sm:$0xf0] }
  0x43   :  { %754 = vmatpush.bf16.msrb.mxu2 %v1967_v48  ;;  %v1773_v48 = vld [vmem:[#allocation8 + $0xb0] sm:$0xf0] }
  0x44   :  { %767 = vmatpush.bf16.msrb.mxu3 %v1975_v49  ;;  %v1779_v49 = vld [vmem:[#allocation8 + $0xa8] sm:$0xf] }
  0x45   :  { %729 = vmatpush.bf16.msrb.mxu0 %v1950_v50  ;;  %v2000_v50 = vld [vmem:[#allocation8 + $0xb4] sm:$0xf0] }
  0x46   :  { %742 = vmatpush.bf16.msrb.mxu1 %v1958_v51  ;;  %v1776_v51 = vor.u32 %v1997_v46, %v1773_v48  ;;  %v1977_v46 = vld [vmem:[#allocation8 + $0x4] sm:$0xf]  ;;  %v1692_v48 = vor.u32 %v1979_v45, %v1691_v44  ;;  %v2014_v44 = vld [vmem:[#allocation9 + $0x28] sm:$0xff] }
  0x47   :  { %755 = vmatpush.bf16.msrb.mxu2 %v1966_v52  ;;  %v1780_v52 = vor.u32 %v2000_v50, %v1779_v49  ;;  %v1693_v49 = vld [vmem:[#allocation8 + $0x10] sm:$0xf0]  ;;  %v1699_v50 = vld [vmem:[#allocation8 + $0x8] sm:$0xf] }
  0x48   :  { %768 = vmatpush.bf16.msrb.mxu3 %v1974_v53  ;;  %v1998_v53 = vld [vmem:[#allocation8 + $0xac] sm:$0xf] }
  0x49   :  { %730 = vmatpush.bf16.msrb.mxu0 %v1949_v54  ;;  %v1781_v54 = vld [vmem:[#allocation8 + $0xb8] sm:$0xf0]  ;;  %v2022_v45 = vld [vmem:[#allocation9 + $0x68] sm:$0xff] }
  0x4a   :  { %743 = vmatpush.bf16.msrb.mxu1 %v1957_v55  ;;  %v1755_v55 = vld [vmem:[#allocation8 + $0x80] sm:$0xf] }
  0x4b   :  { %756 = vmatpush.bf16.msrb.mxu2 %v1965_v56  ;;  %v1784_v56 = vor.u32 %v1998_v53, %v1781_v54  ;;  %v1696_v53 = vor.u32 %v1977_v46, %v1693_v49 }
  0x4c   :  { %769 = vmatpush.bf16.msrb.mxu3 %v1973_v57  ;;  %v1995_v57 = vld [vmem:[#allocation8 + $0x8c] sm:$0xf0] }
  0x4d   :  { %731 = vmatpush.bf16.msrb.mxu0 %v1948_v58  ;;  %v1993_v58 = vld [vmem:[#allocation8 + $0x84] sm:$0xf] }
  0x4e   :  { %744 = vmatpush.bf16.msrb.mxu1 %v1956_v59  ;;  %v1757_v59 = vld [vmem:[#allocation8 + $0x90] sm:$0xf0] }
  0x4f   :  { %757 = vmatpush.bf16.msrb.mxu2 %v1964_v60  ;;  %v1763_v60 = vld [vmem:[#allocation8 + $0x88] sm:$0xf] }
  0x50   :  { %770 = vmatpush.bf16.msrb.mxu3 %v1972_v61  ;;  %v1996_v61 = vld [vmem:[#allocation8 + $0x94] sm:$0xf0] }
  0x51   :  { %732 = vmatpush.bf16.msrb.mxu0 %v1947_v62  ;;  %v1994_v62 = vld [vmem:[#allocation8 + $0x8c] sm:$0xf] }
  0x52   :  { %745 = vmatpush.bf16.msrb.mxu1 %v1955_v63  ;;  %v1756_v63 = vor.u32 %v1995_v57, %v1755_v55  ;;  %v1978_v55 = vld [vmem:[#allocation8 + $0xc] sm:$0xf] }
  0x53   :  { %758 = vmatpush.bf16.msrb.mxu2 %v1963_v0  ;;  %v1765_v0 = vld [vmem:[#allocation8 + $0x98] sm:$0xf0] }
  0x54   :  { %771 = vmatpush.bf16.msrb.mxu3 %v1971_v1  ;;  %v1760_v1 = vor.u32 %v1993_v58, %v1757_v59  ;;  %v2045_v58 = vld [vmem:[#allocation12] ss:$0 sm:$0xff] }
  0x55   :  { %733 = vmatpush.bf16.msrb.mxu0 %v1946_v2  ;;  %v1764_v2 = vor.u32 %v1996_v61, %v1763_v60 }
  0x56   :  { %746 = vmatpush.bf16.msrb.mxu1 %v1954_v3  ;;  %v1768_v3 = vor.u32 %v1994_v62, %v1765_v0 }
  0x57   :  { %759 = vmatpush.bf16.msrb.mxu2 %v1962_v5  ;;  %v1991_v5 = vld [vmem:[#allocation8 + $0x6c] sm:$0xf0] }
  0x58   :  { %772 = vmatpush.bf16.msrb.mxu3 %v1970_v6  ;;  %v1989_v6 = vld [vmem:[#allocation8 + $0x64] sm:$0xf]  ;;  %v1740_v7 = vor.u32 %v1991_v5, %v1739_v4 }
  0x59   :  { %734 = vmatpush.bf16.msrb.mxu0 %v1945_v10  ;;  %v1992_v10 = vld [vmem:[#allocation8 + $0x74] sm:$0xf0] }
  0x5a   :  { %747 = vmatpush.bf16.msrb.mxu1 %v1953_v11  ;;  %v1744_v11 = vor.u32 %v1989_v6, %v1741_v8  ;;  %v1748_v12 = vor.u32 %v1992_v10, %v1747_v9 }
  0x5b   :  { %760 = vmatpush.bf16.msrb.mxu2 %v1961_v14  ;;  %v1749_v14 = vld [vmem:[#allocation8 + $0x78] sm:$0xf0] }
  0x5c   :  { %773 = vmatpush.bf16.msrb.mxu3 %v1969_v15  ;;  %735 = vmatmul.bf16.vlgmr.msrb.gmra.mxu0 %v279_v16  ;;  %v1752_v15 = vor.u32 %v1990_v13, %v1749_v14  ;;  %v1723_v16 = vld [vmem:[#allocation8 + $0x40] sm:$0xf] }
  0x5d   :  { %748 = vmatmul.bf16.vlgmr.msrb.gmra.mxu1 %v280_v17  ;;  %982 = vmatpush.bf16.msra.mxu0 %v1804_v23  ;;  %v1987_v17 = vld [vmem:[#allocation8 + $0x4c] sm:$0xf0]  ;;  %v1988_v23 = vld [vmem:[#allocation8 + $0x54] sm:$0xf0] }
  0x5e   :  { %761 = vmatmul.bf16.vlgmr.msrb.gmra.mxu2 %v281_v18  ;;  %995 = vmatpush.bf16.msra.mxu1 %v1808_v27  ;;  %v1985_v18 = vld [vmem:[#allocation8 + $0x44] sm:$0xf]  ;;  %v1724_v20 = vor.u32 %v1987_v17, %v1723_v16  ;;  %v1732_v26 = vor.u32 %v1988_v23, %v1731_v22  ;;  %v1986_v27 = vld [vmem:[#allocation8 + $0x4c] sm:$0xf]  ;;  %v123_v16 = vlaneseq }
  0x5f   :  { %774 = vmatmul.bf16.vlgmr.msrb.gmra.mxu3 %v282_v19  ;;  %1008 = vmatpush.bf16.msra.mxu2 %v1812_v28  ;;  %v1728_v25 = vor.u32 %v1985_v18, %v1725_v21  ;;  %v1733_v28 = vld [vmem:[#allocation8 + $0x58] sm:$0xf0] }
  0x60   :  { %1021 = vmatpush.bf16.msra.mxu3 %v1816_v32  ;;  %v1736_v29 = vor.u32 %v1986_v27, %v1733_v28  ;;  %v1981_v32 = vld [vmem:[#allocation8 + $0x24] sm:$0xf]  ;;  %v124_v21 = vshrl.u32 %v123_v16, 7  ;;  %v2024_v27 = vld [vmem:[#allocation9 + $0x78] sm:$0xff]  ;;  %v2249_v28 = vmov 0.0  }
  0x61   :  { %983 = vmatpush.bf16.msra.mxu0 %v1788_v36  ;;  %v1984_v36 = vld [vmem:[#allocation8 + $0x34] sm:$0xf0] }
  0x62   :  { %996 = vmatpush.bf16.msra.mxu1 %v1792_v37  ;;  %v1712_v37 = vor.u32 %v1981_v32, %v1709_v34  ;;  %v1716_v38 = vor.u32 %v1984_v36, %v1715_v35  ;;  %vm125_vm0 = vcmp.lt.s32.totalorder %v124_v21, 4 }
  0x63   :  { %1009 = vmatpush.bf16.msra.mxu2 %v1796_v41 }
  0x64   :  { %1022 = vmatpush.bf16.msra.mxu3 %v1800_v43 }
  0x65   :  { %984 = vmatpush.bf16.msra.mxu0 %v1772_v47 }
  0x66   :  { %997 = vmatpush.bf16.msra.mxu1 %v1776_v51  ;;  %v1980_v51 = vld [vmem:[#allocation8 + $0x14] sm:$0xf0] }
  0x67   :  { %1010 = vmatpush.bf16.msra.mxu2 %v1780_v52  ;;  %v1700_v54 = vor.u32 %v1980_v51, %v1699_v50 }
  0x68   :  { %1023 = vmatpush.bf16.msra.mxu3 %v1784_v56  ;;  %v1701_v56 = vld [vmem:[#allocation8 + $0x18] sm:$0xf0] }
  0x69   :  { %985 = vmatpush.bf16.msra.mxu0 %v1756_v63  ;;  %v1704_v57 = vor.u32 %v1978_v55, %v1701_v56 }
  0x6a   :  { %998 = vmatpush.bf16.msra.mxu1 %v1760_v1 }
  0x6b   :  { %1011 = vmatpush.bf16.msra.mxu2 %v1764_v2 }
  0x6c   :  { %1024 = vmatpush.bf16.msra.mxu3 %v1768_v3 }
  0x6d   :  { %986 = vmatpush.bf16.msra.mxu0 %v1740_v7 }
  0x6e   :  { %999 = vmatpush.bf16.msra.mxu1 %v1744_v11 }
  0x6f   :  { %1012 = vmatpush.bf16.msra.mxu2 %v1748_v12 }
  0x70   :  { %1025 = vmatpush.bf16.msra.mxu3 %v1752_v15  ;;  %v119_v15 = vld [vmem:[#allocation12 + $0x1] sm:$0xf] }
  0x71   :  { %987 = vmatpush.bf16.msra.mxu0 %v1724_v20  ;;  %v814_v17 = vperm.slane %v119_v15, 0  ;;  %v815_v18 = vperm.slane %v119_v15, 1 }
  0x72   :  { %1000 = vmatpush.bf16.msra.mxu1 %v1728_v25  ;;  %v817_v25 = vperm.slane %v119_v15, 3 }
  0x73   :  { %1013 = vmatpush.bf16.msra.mxu2 %v1732_v26  ;;  %v2016_v26 = vld [vmem:[#allocation9 + $0x38] sm:$0xff] }
  0x74   :  { %1026 = vmatpush.bf16.msra.mxu3 %v1736_v29  ;;  %v2318_v29 = vsel %vm125_vm0, 1.0, %v2249_v28 }
  0x75   :  { %988 = vmatpush.bf16.msra.mxu0 %v1708_v33 }
  0x76   :  { %1001 = vmatpush.bf16.msra.mxu1 %v1712_v37 }
  0x77   :  { %1014 = vmatpush.bf16.msra.mxu2 %v1716_v38  ;;  %v2015_v38 = vld [vmem:[#allocation9 + $0x30] sm:$0xff] }
  0x78   :  { %1027 = vmatpush.bf16.msra.mxu3 %v1720_v42 }
  0x79   :  { %989 = vmatpush.bf16.msra.mxu0 %v1692_v48 }
  0x7a   :  { %1002 = vmatpush.bf16.msra.mxu1 %v1696_v53  ;;  %v2021_v53 = vld [vmem:[#allocation9 + $0x60] sm:$0xff] }
  0x7b   :  { %1015 = vmatpush.bf16.msra.mxu2 %v1700_v54 }
  0x7c   :  { %1028 = vmatpush.bf16.msra.mxu3 %v1704_v57 }
  0x7d   :  { %1227 = vmatpush.bf16.msrb.mxu0 %v2016_v26 }
  0x7e   :  { %1240 = vmatpush.bf16.msrb.mxu1 %v2024_v27 }
  0x81   :  { %1228 = vmatpush.bf16.msrb.mxu0 %v2015_v38 }
  0x82   :  { %1241 = vmatpush.bf16.msrb.mxu1 %v2023_v39 }
  0x85   :  { %1229 = vmatpush.bf16.msrb.mxu0 %v2014_v44 }
  0x86   :  { %1242 = vmatpush.bf16.msrb.mxu1 %v2022_v45  ;;  %v2046_v45 = vld [vmem:[#allocation12 + $0x5] ss:$0 sm:$0xff] }
  0x8a   :  { %1243 = vmatpush.bf16.msrb.mxu1 %v2021_v53 }
  0xb9   :  { %v684_v19 = vpop.f32.mrf.mxu0 }
  0xba   :  { %v697_v24 = vpop.f32.mrf.mxu1  ;;  %v685_v61 = vadd.f32 %v2045_v58, %v684_v19  ;;  %v2012_v58 = vld [vmem:[#allocation9 + $0x18] sm:$0xff] }
  0xbc   :  { %v698_v62 = vadd.f32 %v697_v24, %v685_v61  ;;  %v816_v24 = vperm.slane %v119_v15, 2 }
  0xc1   :  { %v710_v41 = vpop.f32.mrf.mxu2  ;;  %v686_v47 = vpop.f32.mrf.mxu0 }
  0xc2   :  { %v723_v43 = vpop.f32.mrf.mxu3  ;;  %v699_v52 = vpop.f32.mrf.mxu1  ;;  %v711_v63 = vadd.f32 %v710_v41, %v698_v62 }
  0xc3   :  { %v2013_v52 = vld [vmem:[#allocation9 + $0x20] sm:$0xff] }
  0xc4   :  { %v724_v0 = vadd.f32 %v723_v43, %v711_v63  ;;  %1230 = vmatpush.bf16.msrb.mxu0 %v2013_v52  ;;  %v2031_v52 = vld [vmem:[#allocation11 + $0x30] sm:$0xff] }
  0xc8   :  { %1231 = vmatpush.bf16.msrb.mxu0 %v2012_v58 }
  0xc9   :  { %v712_v59 = vpop.f32.mrf.mxu2 }
  0xca   :  { %v725_v60 = vpop.f32.mrf.mxu3  ;;  %v2020_v59 = vld [vmem:[#allocation9 + $0x58] sm:$0xff] }
  0xcb   :  { %1244 = vmatpush.bf16.msrb.mxu1 %v2020_v59 }
  0xd9   :  { %v736_v1 = vpop.f32.mrf.mxu0 }
  0xda   :  { %v749_v2 = vpop.f32.mrf.mxu1  ;;  %v737_v3 = vadd.f32 %v736_v1, %v724_v0  ;;  %v2011_v0 = vld [vmem:[#allocation9 + $0x10] sm:$0xff] }
  0xdb   :  { %v2019_v1 = vld [vmem:[#allocation9 + $0x50] sm:$0xff]  ;;  %1232 = vmatpush.bf16.msrb.mxu0 %v2011_v0 }
  0xdc   :  { %v750_v4 = vadd.f32 %v749_v2, %v737_v3  ;;  %1245 = vmatpush.bf16.msrb.mxu1 %v2019_v1 }
  0xe1   :  { %v762_v5 = vpop.f32.mrf.mxu2  ;;  %v738_v8 = vpop.f32.mrf.mxu0 }
  0xe2   :  { %v775_v6 = vpop.f32.mrf.mxu3  ;;  %v763_v7 = vadd.f32 %v762_v5, %v750_v4  ;;  %v751_v9 = vpop.f32.mrf.mxu1 }
  0xe4   :  { %v776_v10 = vadd.f32 %v775_v6, %v763_v7  ;;  %v2010_v6 = vld [vmem:[#allocation9 + $0x8] sm:$0xff] }
  0xe5   :  { %v2018_v7 = vld [vmem:[#allocation9 + $0x48] sm:$0xff]  ;;  %1233 = vmatpush.bf16.msrb.mxu0 %v2010_v6 }
  0xe6   :  { %v779_v11 = vmax.f32 %v776_v10, 0.0  ;;  %1246 = vmatpush.bf16.msrb.mxu1 %v2018_v7 }
  0xe8   :  { %v780_v12 = vpack.c.bf16 %v779_v11, %v779_v11 }
  0xe9   :  { %v764_v13 = vpop.f32.mrf.mxu2 }
  0xea   :  { %v777_v14 = vpop.f32.mrf.mxu3  ;;  %990 = vmatmul.bf16.vlgmr.msra.gmra.mxu0 %v780_v12  ;;  %1003 = vmatmul.bf16.vlgmr.msra.gmra.mxu1 %v780_v12  ;;  %v2017_v13 = vld [vmem:[#allocation9 + $0x40] sm:$0xff] }
  0xeb   :  { %1016 = vmatmul.bf16.vlgmr.msra.gmra.mxu2 %v780_v12  ;;  %1029 = vmatmul.bf16.vlgmr.msra.gmra.mxu3 %v780_v12  ;;  %v2009_v12 = vld [vmem:[#allocation9] sm:$0xff] }
  0xec   :  { %1234 = vmatpush.bf16.msrb.mxu0 %v2009_v12  ;;  %1247 = vmatpush.bf16.msrb.mxu1 %v2017_v13 }
 0x167   :  { %v991_v19 = vpop.f32.mrf.mxu0  ;;  %v1004_v20 = vpop.f32.mrf.mxu1 }
 0x168   :  { %v992_v22 = vadd.f32 %v991_v19, %v814_v17  ;;  %v1005_v23 = vadd.f32 %v1004_v20, %v815_v18 }
 0x16a   :  { %1409 = vst [vmem:[#allocation14] sm:$0xff] %v992_v22 }
 0x16b   :  { %1410 = vst [vmem:[#allocation14 + $0x8] sm:$0xff] %v1005_v23 }
 0x16e   :  { %v1017_v30 = vpop.f32.mrf.mxu2  ;;  %v1030_v31 = vpop.f32.mrf.mxu3 }
 0x16f   :  { %v1018_v32 = vadd.f32 %v1017_v30, %v816_v24  ;;  %v1031_v33 = vadd.f32 %v1030_v31, %v817_v25  ;;  %v993_v34 = vpop.f32.mrf.mxu0  ;;  %v1006_v35 = vpop.f32.mrf.mxu1 }
 0x171   :  { %v1034_v36 = vmul.f32 %v2318_v29, %v1018_v32  ;;  %v1035_v37 = vmul.f32 %v2318_v29, %v1031_v33 }
 0x173   :  { %v1036_v40 = vrot.slane %v1034_v36, 4  ;;  %v1042_v41 = vrot.slane %v1035_v37, 4 }
 0x175   :  { %v1037_v42 = vadd.f32 %v1036_v40, %v1034_v36  ;;  %v1043_v43 = vadd.f32 %v1042_v41, %v1035_v37 }
 0x176   :  { %v1019_v46 = vpop.f32.mrf.mxu2  ;;  %v1032_v47 = vpop.f32.mrf.mxu3 }
 0x177   :  { %v1038_v48 = vrot.slane %v1037_v42, 2  ;;  %v1044_v49 = vrot.slane %v1043_v43, 2 }
 0x179   :  { %v1039_v50 = vadd.f32 %v1038_v48, %v1037_v42  ;;  %v1045_v51 = vadd.f32 %v1044_v49, %v1043_v43  ;;  %v2032_v49 = vld [vmem:[#allocation11 + $0x38] sm:$0xff] }
 0x17a   :  { %1351 = vmatpush.bf16.msrb.mxu2 %v2032_v49 }
 0x17b   :  { %v1040_v54 = vrot.slane %v1039_v50, 1  ;;  %v1046_v55 = vrot.slane %v1045_v51, 1 }
 0x17d   :  { %v1041_v56 = vadd.f32 %v1040_v54, %v1039_v50  ;;  %v1047_v57 = vadd.f32 %v1046_v55, %v1045_v51 }
 0x17e   :  { %1352 = vmatpush.bf16.msrb.mxu2 %v2031_v52 }
 0x17f   :  { %v1048_v60 = vmul.f32 0.25, %v1041_v56  ;;  %v1049_v61 = vmul.f32 0.25, %v1047_v57  ;;  %v2030_v57 = vld [vmem:[#allocation11 + $0x28] sm:$0xff] }
 0x181   :  { %v1050_v62 = vsub.f32 %v1018_v32, %v1048_v60  ;;  %v1051_v63 = vsub.f32 %v1031_v33, %v1049_v61  ;;  %v2029_v60 = vld [vmem:[#allocation11 + $0x20] sm:$0xff] }
 0x182   :  { %1353 = vmatpush.bf16.msrb.mxu2 %v2030_v57 }
 0x183   :  { %v1052_v2 = vmul.f32 %v2318_v29, %v1050_v62  ;;  %v1053_v3 = vmul.f32 %v2318_v29, %v1051_v63 }
 0x185   :  { %v1054_v4 = vmul.f32 %v1052_v2, %v1052_v2  ;;  %v1055_v5 = vmul.f32 %v1053_v3, %v1053_v3  ;;  %v2027_v2 = vld [vmem:[#allocation11 + $0x10] sm:$0xff] }
 0x186   :  { %1354 = vmatpush.bf16.msrb.mxu2 %v2029_v60 }
 0x187   :  { %v1056_v8 = vrot.slane %v1054_v4, 4  ;;  %v1062_v9 = vrot.slane %v1055_v5, 4 }
 0x189   :  { %v1057_v10 = vadd.f32 %v1056_v8, %v1054_v4  ;;  %v1063_v11 = vadd.f32 %v1062_v9, %v1055_v5  ;;  %v2026_v5 = vld [vmem:[#allocation11 + $0x8] sm:$0xff]  ;;  %v2025_v8 = vld [vmem:[#allocation11] sm:$0xff] }
 0x18b   :  { %v1058_v14 = vrot.slane %v1057_v10, 2  ;;  %v1064_v15 = vrot.slane %v1063_v11, 2 }
 0x18d   :  { %v1059_v16 = vadd.f32 %v1058_v14, %v1057_v10  ;;  %v1065_v17 = vadd.f32 %v1064_v15, %v1063_v11 }
 0x18f   :  { %v1060_v18 = vrot.slane %v1059_v16, 1  ;;  %v1066_v19 = vrot.slane %v1065_v17, 1 }
 0x191   :  { %v1061_v20 = vadd.f32 %v1060_v18, %v1059_v16  ;;  %v1067_v21 = vadd.f32 %v1066_v19, %v1065_v17 }
 0x193   :  { %v1068_v22 = vmul.f32 0.25, %v1061_v20  ;;  %v1069_v23 = vmul.f32 0.25, %v1067_v21 }
 0x195   :  { %v1070_v24 = vadd.f32 1e-05, %v1068_v22  ;;  %v1071_v25 = vadd.f32 1e-05, %v1069_v23 }
 0x197   :  { %2049 = vrsqrt.f32 %v1070_v24  ;;  %vm1078_vm3 = vweird.f32 %v1070_v24  ;;  %vm1088_vm5 = vweird.f32 %v1071_v25 }
 0x198   :  { %2051 = vrsqrt.f32 %v1071_v25 }
 0x19d   :  { %v2050_v26 = vpop.eup %2049 }
 0x19e   :  { %v2052_v27 = vpop.eup %2051  ;;  %v1073_v28 = vmul.f32 %v2050_v26, %v1070_v24  ;;  %vm1079_vm1 = vweird.f32 %v2050_v26  ;;  %v2047_v24 = vld [vmem:[#allocation12 + $0x6] ss:$0 sm:$0xff] }
 0x19f   :  { %v1083_v30 = vmul.f32 %v2052_v27, %v1071_v25  ;;  %vm1089_vm2 = vweird.f32 %v2052_v27  ;;  %vm1080_vm4 = vmor %vm1078_vm3, %vm1079_vm1 }
 0x1a0   :  { %v1074_v31 = vmul.f32 %v2050_v26, %v1073_v28  ;;  %vm1090_vm6 = vmor %vm1088_vm5, %vm1089_vm2 }
 0x1a1   :  { %v1084_v32 = vmul.f32 %v2052_v27, %v1083_v30 }
 0x1a2   :  { %v1075_v33 = vmul.f32 0.5, %v1074_v31 }
 0x1a3   :  { %v1085_v34 = vmul.f32 0.5, %v1084_v32 }
 0x1a4   :  { %v1076_v35 = vsub.f32 1.5, %v1075_v33 }
 0x1a5   :  { %v1086_v36 = vsub.f32 1.5, %v1085_v34 }
 0x1a6   :  { %v1077_v37 = vmul.f32 %v2050_v26, %v1076_v35 }
 0x1a7   :  { %v1087_v38 = vmul.f32 %v2052_v27, %v1086_v36 }
 0x1a8   :  { %v1081_v39 = vsel %vm1080_vm4, %v2050_v26, %v1077_v37 }
 0x1a9   :  { %v1092_v40 = vmul.f32 %v1081_v39, %v1050_v62  ;;  %v1091_v41 = vsel %vm1090_vm6, %v2052_v27, %v1087_v38 }
 0x1aa   :  { %v1093_v42 = vmul.f32 %v1091_v41, %v1051_v63  ;;  %v2028_v63 = vld [vmem:[#allocation11 + $0x18] sm:$0xff] }
 0x1ab   :  { %v1094_v43 = vpack.c.bf16 %v1092_v40, %v1092_v40  ;;  %1355 = vmatpush.bf16.msrb.mxu2 %v2028_v63 }
 0x1ac   :  { %v1095_v44 = vpack.c.bf16 %v1093_v42, %v1093_v42 }
 0x1ad   :  { %1235 = vmatmul.bf16.vlgmr.msrb.gmra.mxu0 %v1094_v43 }
 0x1ae   :  { %1248 = vmatmul.bf16.vlgmr.msrb.gmra.mxu1 %v1095_v44 }
 0x1af   :  { %1356 = vmatpush.bf16.msrb.mxu2 %v2027_v2 }
 0x1b3   :  { %1357 = vmatpush.bf16.msrb.mxu2 %v2026_v5 }
 0x1b7   :  { %1358 = vmatpush.bf16.msrb.mxu2 %v2025_v8 }
 0x22a   :  { %v1236_v46 = vpop.f32.mrf.mxu0 }
 0x22b   :  { %v1237_v47 = vadd.f32 %v2046_v45, %v1236_v46  ;;  %v1249_v48 = vpop.f32.mrf.mxu1 }
 0x22d   :  { %v1250_v50 = vadd.f32 %v1249_v48, %v1237_v47 }
 0x22f   :  { %v1253_v51 = vmul.f32 %v2318_v29, %v1250_v50 }
 0x231   :  { %v1254_v53 = vrot.slane %v1253_v51, 4 }
 0x232   :  { %v1238_v54 = vpop.f32.mrf.mxu0 }
 0x233   :  { %v1255_v55 = vadd.f32 %v1254_v53, %v1253_v51  ;;  %v1251_v56 = vpop.f32.mrf.mxu1 }
 0x235   :  { %v1256_v58 = vrot.slane %v1255_v55, 2 }
 0x237   :  { %v1257_v59 = vadd.f32 %v1256_v58, %v1255_v55  ;;  %v1402_v58 = vstv %s2340_s6 }
 0x239   :  { %v1258_v61 = vrot.slane %v1257_v59, 1 }
 0x23b   :  { %v1259_v62 = vadd.f32 %v1258_v61, %v1257_v59 }
 0x23d   :  { %v1260_v0 = vmul.f32 0.25, %v1259_v62 }
 0x23f   :  { %v1261_v1 = vsub.f32 %v1250_v50, %v1260_v0 }
 0x241   :  { %v1262_v3 = vmul.f32 %v2318_v29, %v1261_v1 }
 0x243   :  { %v1263_v4 = vmul.f32 %v1262_v3, %v1262_v3 }
 0x245   :  { %v1264_v6 = vrot.slane %v1263_v4, 4 }
 0x247   :  { %v1265_v7 = vadd.f32 %v1264_v6, %v1263_v4 }
 0x249   :  { %v1266_v9 = vrot.slane %v1265_v7, 2 }
 0x24b   :  { %v1267_v10 = vadd.f32 %v1266_v9, %v1265_v7 }
 0x24d   :  { %v1268_v11 = vrot.slane %v1267_v10, 1 }
 0x24f   :  { %v1269_v12 = vadd.f32 %v1268_v11, %v1267_v10 }
 0x251   :  { %v1270_v13 = vmul.f32 0.25, %v1269_v12 }
 0x253   :  { %v1271_v14 = vadd.f32 1e-05, %v1270_v13 }
 0x255   :  { %2053 = vrsqrt.f32 %v1271_v14  ;;  %vm1278_vm8 = vweird.f32 %v1271_v14 }
 0x25b   :  { %v2054_v15 = vpop.eup %2053 }
 0x25c   :  { %v1273_v16 = vmul.f32 %v2054_v15, %v1271_v14  ;;  %vm1279_vm7 = vweird.f32 %v2054_v15 }
 0x25d   :  { %vm1280_vm9 = vmor %vm1278_vm8, %vm1279_vm7 }
 0x25e   :  { %v1274_v17 = vmul.f32 %v2054_v15, %v1273_v16 }
 0x260   :  { %v1275_v18 = vmul.f32 0.5, %v1274_v17 }
 0x262   :  { %v1276_v19 = vsub.f32 1.5, %v1275_v18 }
 0x264   :  { %v1277_v20 = vmul.f32 %v2054_v15, %v1276_v19 }
 0x266   :  { %v1281_v21 = vsel %vm1280_vm9, %v2054_v15, %v1277_v20 }
 0x267   :  { %v1282_v22 = vmul.f32 %v1281_v21, %v1261_v1 }
 0x269   :  { %v1283_v23 = vpack.c.bf16 %v1282_v22, %v1282_v22 }
 0x26b   :  { %1359 = vmatmul.bf16.vlgmr.msrb.gmra.mxu2 %v1283_v23 }
 0x2ee   :  { %v1360_v25 = vpop.f32.mrf.mxu2 }
 0x2ef   :  { %v1361_v26 = vadd.f32 %v2047_v24, %v1360_v25 }
 0x2f1   :  { %v1364_v27 = vmax.f32 %v1361_v26, 0.0 }
 0x2f3   :  { %v1365_v28 = vmul.f32 %v2318_v29, %v1364_v27 }
 0x2f5   :  { %v1366_v30 = vrot.slane %v1365_v28, 4 }
 0x2f6   :  { %v1362_v31 = vpop.f32.mrf.mxu2 }
 0x2f7   :  { %v1367_v32 = vadd.f32 %v1366_v30, %v1365_v28 }
 0x2f9   :  { %v1368_v33 = vrot.slane %v1367_v32, 2 }
 0x2fb   :  { %v1369_v34 = vadd.f32 %v1368_v33, %v1367_v32 }
 0x2fd   :  { %v1370_v35 = vrot.slane %v1369_v34, 1 }
 0x2ff   :  { %v1371_v36 = vadd.f32 %v1370_v35, %v1369_v34 }
 0x301   :  { %v1372_v37 = vmul.f32 0.25, %v1371_v36 }
 0x303   :  { %v1373_v38 = vsub.f32 %v1364_v27, %v1372_v37 }
 0x305   :  { %v1374_v39 = vmul.f32 %v2318_v29, %v1373_v38  ;;  %v2048_v29 = vld [vmem:[#allocation12 + $0x7] ss:$0 sm:$0xff] }
 0x307   :  { %v1375_v40 = vmul.f32 %v1374_v39, %v1374_v39 }
 0x309   :  { %v1376_v41 = vrot.slane %v1375_v40, 4 }
 0x30b   :  { %v1377_v42 = vadd.f32 %v1376_v41, %v1375_v40 }
 0x30d   :  { %v1378_v43 = vrot.slane %v1377_v42, 2 }
 0x30f   :  { %v1379_v44 = vadd.f32 %v1378_v43, %v1377_v42 }
 0x311   :  { %v1380_v45 = vrot.slane %v1379_v44, 1 }
 0x313   :  { %v1381_v46 = vadd.f32 %v1380_v45, %v1379_v44 }
 0x315   :  { %v1382_v47 = vmul.f32 0.25, %v1381_v46 }
 0x317   :  { %v1383_v48 = vadd.f32 1e-05, %v1382_v47 }
 0x319   :  { %2055 = vrsqrt.f32 %v1383_v48  ;;  %vm1390_vm11 = vweird.f32 %v1383_v48 }
 0x31f   :  { %v2056_v49 = vpop.eup %2055 }
 0x320   :  { %v1385_v50 = vmul.f32 %v2056_v49, %v1383_v48  ;;  %vm1391_vm10 = vweird.f32 %v2056_v49 }
 0x321   :  { %vm1392_vm12 = vmor %vm1390_vm11, %vm1391_vm10 }
 0x322   :  { %v1386_v51 = vmul.f32 %v2056_v49, %v1385_v50 }
 0x324   :  { %v1387_v52 = vmul.f32 0.5, %v1386_v51 }
 0x326   :  { %v1388_v53 = vsub.f32 1.5, %v1387_v52 }
 0x328   :  { %v1389_v54 = vmul.f32 %v2056_v49, %v1388_v53 }
 0x32a   :  { %v1393_v55 = vsel %vm1392_vm12, %v2056_v49, %v1389_v54 }
 0x32b   :  { %v1394_v56 = vmul.f32 %v1393_v55, %v1373_v38 }
 0x32d   :  { %v1398_v57 = vmul.f32 %v2048_v29, %v1394_v56 }
 0x32f   :  { %1399 = vadd.xlane.f32.xlu0 %v1398_v57 }
 0x3a2   :  { %v1400_v59 = vpop.xlane.xlu0 %1399 }
 0x3a3   :  { %v1403_v60 = vadd.f32 %v1402_v58, %v1400_v59 }
 0x3a5   :  { %v1404_v61 = vsub.f32 0.0, %v1403_v60 }
 0x3a7   :  { %v1405_v62 = vmul.f32 1.442695, %v1404_v61 }
 0x3a9   :  { %2057 = vpow2.f32 %v1405_v62 }
 0x3af   :  { %v2058_v63 = vpop.eup %2057 }
 0x3b0   :  { %v1407_v0 = vadd.f32 1.0, %v2058_v63 }
 0x3b2   :  { %2059 = vrcp.f32 %v1407_v0 }
 0x3b8   :  { %v2060_v1 = vpop.eup %2059 }
 0x3b9   :  { %1411 = vst [vmem:[#allocation14 + $0x10] sm:$0xff] %v2060_v1 }
 0x3ba   :  { %1422 = dma.vmem_to_hbm [thread:$0]  %s1418_s9, 384, %s1420_s12, [#allocation5]  }
 0x3bb   :  { %2237 = dma.done.wait [#allocation5], 384  }
 0x3bc   :  { %2238 = vsyncadd [#allocation5], 4294966912 }
 0x3bd   :  { %1427 = vsyncpa [#allocation4], 1 }
 0x3be   :  { %1428 = vsyncpa [#allocation7], 1 }
 0x3bf   :  { %1429 = vsyncpa [#allocation10], 1 }
 0x3c0   :  { %1430 = vsyncpa [#allocation13], 1 }
 0x3c1   :  { %1431 = vsyncpa [#allocation5], 1 }

</bundles_post_ra>
